<compile_context>
chip_gen: v5e
topology: v5e:2x2
jax: 0.10.0
libtpu: 0.0.40
codegen_flags: <defaults>
</compile_context>

<pallas_src>
import functools

import numpy as np
import jax
import jax.numpy as jnp
from jax.experimental import pallas as pl
from jax.experimental.pallas import tpu as pltpu

BN_MOMENTUM = 0.1
BN_EPS = 1e-5


# ------------------------ host-side constant builders (trace time) ------------------------

@functools.lru_cache(maxsize=None)
def _ones_expand_np(C, L):
    """[C, C*L] block-ones matrix E with E[c, c*L + k] = 1.
    Used both ways: pooled = x @ E^T / L (segmented per-channel lane mean) and
    scale_flat = s @ E (broadcast a per-channel value across its L lanes)."""
    e = np.zeros((C, C * L), dtype=np.float32)
    for c in range(C):
        e[c, c * L:(c + 1) * L] = 1.0
    return e


@functools.lru_cache(maxsize=None)
def _pool2_blockdiag_np(C, H, W):
    """Block-diagonal AvgPool2d(2) matrix Pt of shape [C*H*W, C*(H//2)*(W//2)]:
    Pt[c*HW + src, c*HoWo + dst] = 0.25 for the 4 source pixels of output pixel dst.
    One MXU matmul x_flat @ Pt pools ALL channels and yields a lane-dense output slab.
    NOTE: O(C^2*HW*HoWo) bytes -- 1 MiB at this size; for large C*H*W switch to a
    per-channel [HW, HoWo] matrix or a factored W-then-H pool."""
    assert H % 2 == 0 and W % 2 == 0, "AvgPool2d(2) path requires even H and W"
    Ho, Wo = H // 2, W // 2
    HW, HoWo = H * W, Ho * Wo
    ho, wo = np.meshgrid(np.arange(Ho), np.arange(Wo), indexing="ij")
    dst = (ho * Wo + wo).reshape(-1)
    pt = np.zeros((C * HW, C * HoWo), dtype=np.float32)
    for dy in range(2):
        for dx in range(2):
            src = ((2 * ho + dy) * W + (2 * wo + dx)).reshape(-1)
            for c in range(C):
                pt[c * HW + src, c * HoWo + dst] = 0.25
    return pt


# ---------------------------------- Pallas kernels ----------------------------------

def _se_gate(pooled, p1, p2, C, Ch):
    """Squeeze/excite MLP: sigmoid(W2 relu(W1 pooled + b1) + b2); pooled is [Bn, C]."""
    w1m, b1 = p1[:C, :], p1[C:, :]          # [C, Ch], [1, Ch]
    w2m, b2 = p2[:Ch, :], p2[Ch:, :]        # [Ch, C], [1, C]
    # Tiny (C -> C/2 -> C): broadcast-multiply + reduce keeps it on the VPU; switch to
    # jnp.dot if C grows beyond ~64-128 so the MXU picks it up.
    h = jnp.maximum(jnp.sum(pooled[:, :, None] * w1m[None, :, :], axis=1) + b1, 0.0)
    s = jax.nn.sigmoid(jnp.sum(h[:, :, None] * w2m[None, :, :], axis=1) + b2)
    return s                                 # [Bn, C]


def _se_scale_kernel(x_ref, p1_ref, p2_ref, e_ref, o_ref, *, C, Ch, HW):
    """stride==1: out = x * sigmoid(MLP(GAP(x))), all in [Bn, C*HW] lane-dense layout."""
    xb = x_ref[...].astype(jnp.float32)               # [Bn, C*HW]
    e = e_ref[...]                                     # [C, C*HW] block-ones
    # Per-channel global average pool as a segmented lane reduce on the MXU.
    pooled = jax.lax.dot_general(xb, e, (((1,), (1,)), ((), ())),
                                 preferred_element_type=jnp.float32) * (1.0 / HW)
    s = _se_gate(pooled, p1_ref[...], p2_ref[...], C, Ch)           # [Bn, C]
    scale = jnp.dot(s, e, preferred_element_type=jnp.float32)       # [Bn, C*HW]
    o_ref[...] = (xb * scale).astype(o_ref.dtype)


def _se_scale_pool_bn_kernel(x_ref, p1_ref, p2_ref, pt_ref, e_ref, bn_ref, o_ref,
                             *, C, Ch, HoWo):
    """stride!=1: BN(AvgPool2d(2)(x * gate)) = pool2(x) * (gate*bn_scale) + bn_bias
    (gate constant per channel, BN folded into per-channel scale/bias)."""
    xb = x_ref[...].astype(jnp.float32)                # [Bn, C*HW]
    # AvgPool2d(2) of every channel in ONE matmul -> lane-dense [Bn, C*HoWo] slab.
    xp = jnp.dot(xb, pt_ref[...], preferred_element_type=jnp.float32)
    e = e_ref[...]                                     # [C, C*HoWo] block-ones
    # Global mean == mean of the disjoint 2x2 window means: compute GAP from xp
    # (one pass over x total, 4x smaller reduction).
    pooled = jax.lax.dot_general(xp, e, (((1,), (1,)), ((), ())),
                                 preferred_element_type=jnp.float32) * (1.0 / HoWo)
    s = _se_gate(pooled, p1_ref[...], p2_ref[...], C, Ch)           # [Bn, C]
    bn = bn_ref[...]                                   # [2, C]: row0 = scale, row1 = bias
    scale = jnp.dot(s * bn[0:1, :], e, preferred_element_type=jnp.float32)  # [Bn, C*HoWo]
    bias = jnp.dot(bn[1:2, :], e, preferred_element_type=jnp.float32)       # [1, C*HoWo]
    o_ref[...] = (xp * scale + bias).astype(o_ref.dtype)


# ------------------------------------ wrappers ------------------------------------

def _pick_block_n(N, max_block=64):
    """Few, large batch blocks: a single grid step for small N (amortizes the ~600-cycle
    per-step overhead on 1-TC chips); otherwise the largest divisor of N that is a
    multiple of 8 (full sublane tiles).  On v7x with large N this leaves >=2 grid steps
    so the two TensorCores split the ("parallel",) batch axis."""
    if N <= max_block:
        return N
    best = 0
    for bn in range(8, max_block + 1, 8):
        if N % bn == 0:
            best = bn
    return best if best else N


def _const_spec(shape):
    return pl.BlockSpec(shape, lambda i: (0,) * len(shape))


def se_scale(x_flat, p1, p2, e, *, C, Ch, block_n):
    N, CHW = x_flat.shape
    HW = CHW // C
    kernel = functools.partial(_se_scale_kernel, C=C, Ch=Ch, HW=HW)
    return pl.pallas_call(
        kernel,
        out_shape=jax.ShapeDtypeStruct((N, CHW), x_flat.dtype),
        grid=(N // block_n,),
        in_specs=[
            pl.BlockSpec((block_n, CHW), lambda i: (i, 0)),
            _const_spec(p1.shape),      # packed (w1 | b1), resident in VMEM
            _const_spec(p2.shape),      # packed (w2 | b2), resident in VMEM
            _const_spec(e.shape),       # block-ones expansion matrix, resident
        ],
        out_specs=pl.BlockSpec((block_n, CHW), lambda i: (i, 0)),
        compiler_params=pltpu.CompilerParams(dimension_semantics=("parallel",)),
    )(x_flat, p1, p2, e)


def se_scale_pool_bn(x_flat, p1, p2, pt, e, bn2, *, C, Ch, block_n):
    N, CHW = x_flat.shape
    CHoWo = pt.shape[1]
    HoWo = CHoWo // C
    kernel = functools.partial(_se_scale_pool_bn_kernel, C=C, Ch=Ch, HoWo=HoWo)
    return pl.pallas_call(
        kernel,
        out_shape=jax.ShapeDtypeStruct((N, CHoWo), x_flat.dtype),
        grid=(N // block_n,),
        in_specs=[
            pl.BlockSpec((block_n, CHW), lambda i: (i, 0)),
            _const_spec(p1.shape),
            _const_spec(p2.shape),
            _const_spec(pt.shape),      # block-diag pooling matrix, resident in VMEM
            _const_spec(e.shape),
            _const_spec(bn2.shape),     # folded BN (scale | bias)
        ],
        out_specs=pl.BlockSpec((block_n, CHoWo), lambda i: (i, 0)),
        compiler_params=pltpu.CompilerParams(dimension_semantics=("parallel",)),
    )(x_flat, p1, p2, pt, e, bn2)


def se_block_forward(x, params, stride):
    """SE_Block.forward (NCHW in / NCHW out)."""
    w1, b1, w2, b2, gamma, beta, mean, var = params
    N, C, H, W = x.shape
    Ch = w1.shape[0]
    HW = H * W
    x_flat = x.reshape(N, C * HW)   # lane-dense: a sample's whole C*H*W on the lane axis
    # Pack the tiny SE-MLP operands into two arrays (fewer startup DMA descriptors).
    p1 = jnp.concatenate([w1.reshape(Ch, C).T.astype(jnp.float32),
                          b1.reshape(1, Ch).astype(jnp.float32)], axis=0)   # [C+1, Ch]
    p2 = jnp.concatenate([w2.reshape(C, Ch).T.astype(jnp.float32),
                          b2.reshape(1, C).astype(jnp.float32)], axis=0)    # [Ch+1, C]
    block_n = _pick_block_n(N)
    if stride == 1:
        e = _ones_expand_np(C, HW)
        out = se_scale(x_flat, p1, p2, e, C=C, Ch=Ch, block_n=block_n)
        return out.reshape(N, C, H, W)
    # Fold BatchNorm (inference running-stats) into a per-channel scale/bias.
    inv_std = jax.lax.rsqrt(var.astype(jnp.float32) + BN_EPS)
    bn_scale = gamma.astype(jnp.float32) * inv_std
    bn_bias = beta.astype(jnp.float32) - mean.astype(jnp.float32) * bn_scale
    bn2 = jnp.stack([bn_scale, bn_bias], axis=0)            # [2, C]
    pt = _pool2_blockdiag_np(C, H, W)                       # host-built constant
    e = _ones_expand_np(C, (H // 2) * (W // 2))
    out = se_scale_pool_bn(x_flat, p1, p2, pt, e, bn2, C=C, Ch=Ch, block_n=block_n)
    return out.reshape(N, C, H // 2, W // 2)


# ------------------------------ reference & test ------------------------------

def init_params(key, C):
    Ch = C // 2
    ks = jax.random.split(key, 8)
    bound1 = 1.0 / (C ** 0.5)
    w1 = jax.random.uniform(ks[0], (Ch, C, 1, 1), jnp.float32, -bound1, bound1)
    b1 = jax.random.uniform(ks[1], (Ch,), jnp.float32, -bound1, bound1)
    bound2 = 1.0 / (Ch ** 0.5)
    w2 = jax.random.uniform(ks[2], (C, Ch, 1, 1), jnp.float32, -bound2, bound2)
    b2 = jax.random.uniform(ks[3], (C,), jnp.float32, -bound2, bound2)
    gamma = jax.random.uniform(ks[4], (C,), jnp.float32, 0.5, 1.5)
    beta = jax.random.uniform(ks[5], (C,), jnp.float32, -0.5, 0.5)
    mean = jax.random.uniform(ks[6], (C,), jnp.float32, -0.5, 0.5)
    var = jax.random.uniform(ks[7], (C,), jnp.float32, 0.5, 1.5)
    return (w1, b1, w2, b2, gamma, beta, mean, var)


def reference_forward(x, params, stride):
    """Pure-JAX reference (no Pallas)."""
    w1, b1, w2, b2, gamma, beta, mean, var = params
    N, C, H, W = x.shape
    Ch = w1.shape[0]
    p = x.mean(axis=(2, 3))                                       # AdaptiveAvgPool2d(1)
    h = jnp.maximum(p @ w1.reshape(Ch, C).T + b1, 0.0)            # conv1 (1x1) + ReLU
    s = jax.nn.sigmoid(h @ w2.reshape(C, Ch).T + b2)              # conv2 (1x1) + sigmoid
    out = x * s[:, :, None, None]
    if stride == 1:
        return out
    out = out.reshape(N, C, H // 2, 2, W // 2, 2).mean(axis=(3, 5))   # AvgPool2d(2)
    inv = jax.lax.rsqrt(var + BN_EPS)
    out = ((out - mean[None, :, None, None]) * inv[None, :, None, None]
           * gamma[None, :, None, None] + beta[None, :, None, None])  # BatchNorm2d (eval)
    return out


if __name__ == "__main__":
    # SE_Block(C_in=4, stride) on x of shape [2, 4, 16, 16]; test both stride paths.
    N, C, H, W = 2, 4, 16, 16
    key = jax.random.PRNGKey(0)
    kx, kp = jax.random.split(key)
    x = jax.random.normal(kx, (N, C, H, W), jnp.float32)
    params = init_params(kp, C)

    fwd = jax.jit(se_block_forward, static_argnums=(2,))
    for stride in (1, 2):
        out = jax.block_until_ready(fwd(x, params, stride))
        ref = reference_forward(x, params, stride)
        assert out.shape == ref.shape, (stride, out.shape, ref.shape)
        err = float(jnp.max(jnp.abs(out - ref)))
        assert jnp.allclose(out, ref, rtol=1e-4, atol=1e-4), (stride, err)
    print("KERNEL_OK")
</pallas_src>

<mosaic_0001>
module attributes {stable_mosaic.version = 11 : i64} {
  func.func @_se_scale_kernel(%arg0: i32, %arg1: memref<2x1024xf32, #tpu.memory_space<vmem>>, %arg2: memref<5x2xf32, #tpu.memory_space<vmem>>, %arg3: memref<3x4xf32, #tpu.memory_space<vmem>>, %arg4: memref<4x1024xf32, #tpu.memory_space<vmem>>, %arg5: memref<2x1024xf32, #tpu.memory_space<vmem>>) attributes {dimension_semantics = [#tpu.dimension_semantics<parallel>], iteration_bounds = array<i64: 1>, scalar_prefetch = 0 : i64, scratch_operands = 0 : i64, tpu.core_type = #tpu.core_type<tc>, window_params = [{transform_indices = @transform_0, window_bounds = array<i64: 2, 1024>}, {pipeline_mode = #tpu.pipeline_mode<synchronous>, transform_indices = @transform_1, window_bounds = array<i64: 5, 2>}, {pipeline_mode = #tpu.pipeline_mode<synchronous>, transform_indices = @transform_2, window_bounds = array<i64: 3, 4>}, {pipeline_mode = #tpu.pipeline_mode<synchronous>, transform_indices = @transform_3, window_bounds = array<i64: 4, 1024>}, {transform_indices = @transform_4, window_bounds = array<i64: 2, 1024>}]} {
    %c0 = arith.constant 0 : index
    %c0_0 = arith.constant 0 : index
    %0 = vector.load %arg1[%c0, %c0_0] : memref<2x1024xf32, #tpu.memory_space<vmem>>, vector<2x1024xf32>
    %c0_1 = arith.constant 0 : index
    %c0_2 = arith.constant 0 : index
    %1 = vector.load %arg4[%c0_1, %c0_2] : memref<4x1024xf32, #tpu.memory_space<vmem>>, vector<4x1024xf32>
    %cst = arith.constant dense<0.000000e+00> : vector<2x4xf32>
    %2 = tpu.matmul %0, %1, %cst {dimension_numbers = #tpu.dot_dimension_numbers<[1], [1], [0], [0], [0, 0, 1, 0], [], []>} : vector<2x1024xf32>, vector<4x1024xf32>, vector<2x4xf32> -> vector<2x4xf32>
    %cst_3 = arith.constant 3.906250e-03 : f32
    %3 = vector.broadcast %cst_3 : f32 to vector<2x4xf32>
    %4 = arith.mulf %2, %3 : vector<2x4xf32>
    %c0_4 = arith.constant 0 : index
    %c0_5 = arith.constant 0 : index
    %5 = vector.load %arg2[%c0_4, %c0_5] : memref<5x2xf32, #tpu.memory_space<vmem>>, vector<5x2xf32>
    %c0_6 = arith.constant 0 : index
    %c0_7 = arith.constant 0 : index
    %6 = vector.load %arg3[%c0_6, %c0_7] : memref<3x4xf32, #tpu.memory_space<vmem>>, vector<3x4xf32>
    %7 = vector.extract_strided_slice %5 {offsets = [0, 0], sizes = [4, 2], strides = [1, 1]} : vector<5x2xf32> to vector<4x2xf32>
    %8 = vector.extract_strided_slice %5 {offsets = [4, 0], sizes = [1, 2], strides = [1, 1]} : vector<5x2xf32> to vector<1x2xf32>
    %9 = vector.extract_strided_slice %6 {offsets = [0, 0], sizes = [2, 4], strides = [1, 1]} : vector<3x4xf32> to vector<2x4xf32>
    %10 = vector.extract_strided_slice %6 {offsets = [2, 0], sizes = [1, 4], strides = [1, 1]} : vector<3x4xf32> to vector<1x4xf32>
    %11 = vector.shape_cast %4 : vector<2x4xf32> to vector<2x4x1xf32>
    %12 = vector.shape_cast %7 : vector<4x2xf32> to vector<1x4x2xf32>
    %13 = vector.broadcast %11 : vector<2x4x1xf32> to vector<2x4x2xf32>
    %14 = vector.broadcast %12 : vector<1x4x2xf32> to vector<2x4x2xf32>
    %15 = arith.mulf %13, %14 : vector<2x4x2xf32>
    %cst_8 = arith.constant dense<0.000000e+00> : vector<2x2xf32>
    %16 = vector.multi_reduction <add>, %15, %cst_8 [1] : vector<2x4x2xf32> to vector<2x2xf32>
    %17 = vector.broadcast %8 : vector<1x2xf32> to vector<2x2xf32>
    %18 = arith.addf %16, %17 : vector<2x2xf32>
    %cst_9 = arith.constant 0.000000e+00 : f32
    %19 = vector.broadcast %cst_9 : f32 to vector<2x2xf32>
    %20 = arith.maximumf %18, %19 : vector<2x2xf32>
    %21 = vector.shape_cast %20 : vector<2x2xf32> to vector<2x2x1xf32>
    %22 = vector.shape_cast %9 : vector<2x4xf32> to vector<1x2x4xf32>
    %23 = vector.broadcast %21 : vector<2x2x1xf32> to vector<2x2x4xf32>
    %24 = vector.broadcast %22 : vector<1x2x4xf32> to vector<2x2x4xf32>
    %25 = arith.mulf %23, %24 : vector<2x2x4xf32>
    %cst_10 = arith.constant dense<0.000000e+00> : vector<2x4xf32>
    %26 = vector.multi_reduction <add>, %25, %cst_10 [1] : vector<2x2x4xf32> to vector<2x4xf32>
    %27 = vector.broadcast %10 : vector<1x4xf32> to vector<2x4xf32>
    %28 = arith.addf %26, %27 : vector<2x4xf32>
    %29 = arith.negf %28 : vector<2x4xf32>
    %30 = math.exp %29 : vector<2x4xf32>
    %cst_11 = arith.constant 1.000000e+00 : f32
    %31 = vector.broadcast %cst_11 : f32 to vector<2x4xf32>
    %32 = arith.addf %31, %30 : vector<2x4xf32>
    %33 = arith.divf %31, %32 : vector<2x4xf32>
    %cst_12 = arith.constant dense<0.000000e+00> : vector<2x1024xf32>
    %34 = tpu.matmul %33, %1, %cst_12 {dimension_numbers = #tpu.dot_dimension_numbers<[1], [0], [0], [1], [0, 0, 1, 1], [], []>} : vector<2x4xf32>, vector<4x1024xf32>, vector<2x1024xf32> -> vector<2x1024xf32>
    %35 = arith.mulf %0, %34 : vector<2x1024xf32>
    %c0_13 = arith.constant 0 : index
    %c0_14 = arith.constant 0 : index
    %36 = vector.load %arg5[%c0_13, %c0_14] : memref<2x1024xf32, #tpu.memory_space<vmem>>, vector<2x1024xf32>
    tpu.vector_store %arg5[%c0_13, %c0_14], %35 {strides = array<i32>} : memref<2x1024xf32, #tpu.memory_space<vmem>>, vector<2x1024xf32>,
    return
  }
  func.func @transform_0(%arg0: i32) -> (i32, i32) {
    %c0_i32 = arith.constant 0 : i32
    %c0_i32_0 = arith.constant 0 : i32
    return %arg0, %c0_i32 : i32, i32
  }
  func.func @transform_1(%arg0: i32) -> (i32, i32) {
    %c0_i32 = arith.constant 0 : i32
    %c0_i32_0 = arith.constant 0 : i32
    %c0_i32_1 = arith.constant 0 : i32
    return %c0_i32, %c0_i32_0 : i32, i32
  }
  func.func @transform_2(%arg0: i32) -> (i32, i32) {
    %c0_i32 = arith.constant 0 : i32
    %c0_i32_0 = arith.constant 0 : i32
    %c0_i32_1 = arith.constant 0 : i32
    return %c0_i32, %c0_i32_0 : i32, i32
  }
  func.func @transform_3(%arg0: i32) -> (i32, i32) {
    %c0_i32 = arith.constant 0 : i32
    %c0_i32_0 = arith.constant 0 : i32
    %c0_i32_1 = arith.constant 0 : i32
    return %c0_i32, %c0_i32_0 : i32, i32
  }
  func.func @transform_4(%arg0: i32) -> (i32, i32) {
    %c0_i32 = arith.constant 0 : i32
    %c0_i32_0 = arith.constant 0 : i32
    return %arg0, %c0_i32 : i32, i32
  }
}

</mosaic_0001>

<bundles_post_ra>
// kernel: se_block_forward.1
= control target key start
LH: loop header
LB: loop body
LE: loop exit
PB: predicated region body
PF: predicated region fallthrough
CT: control target
= control target key end

     0   :  { %v235_v22 = vlaneseq  ;;  %vm250_vm0 = vcmask 11264   ;;  %vm286_vm1 = vcmask 25600   ;;  %vm365_vm2 = vcmask 1043456   ;;  %s679_s0 = inlined_call_operand.vmem [shape: f32[2,1024], index: 0, kind: input, shape index: {}]   ;;  %s680_s3 = inlined_call_operand.vmem [shape: f32[4,1024], index: 3, kind: input, shape index: {}]   ;;  %s681_s1 = inlined_call_operand.vmem [shape: f32[5,2], index: 1, kind: input, shape index: {}]   ;;  %s682_s2 = inlined_call_operand.vmem [shape: f32[3,4], index: 2, kind: input, shape index: {}]   ;;  %s683_s4 = inlined_call_operand.vmem [shape: f32[2,1024], index: 4, kind: output, shape index: {}]  }
   0x1   :  { %v630_v0 = vld [vmem:[%s679_s0] sm:$0xff]  ;;  %v636_v1 = vld [vmem:[%s679_s0 + $0x8] sm:$0xff]  ;;  %v22_v7 = vld [vmem:[%s680_s3 + $0x18] sm:$0xff]  ;;  %vm345_vm10 = vcmask 1041409   ;;  %vm362_vm12 = vcmask 31744   ;;  %vm556_vm13 = vcmask 1041408  }
   0x2   :  { %25 = vst [vmem:[#allocation1] ss:$4 sm:$0xff] %v630_v0  ;;  %v20_v2 = vld [vmem:[%s680_s3 + $0x8] sm:$0xff]  ;;  %v19_v3 = vld [vmem:[%s680_s3] sm:$0xff]  ;;  %v21_v11 = vld [vmem:[%s680_s3 + $0x10] sm:$0xff]  ;;  %v236_v23 = vshrl.u32 %v235_v22, 7 }
   0x3   :  { %27 = vst [vmem:[#allocation1 + $0x20] ss:$4 sm:$0xff] %v636_v1  ;;  %v232_v42 = vld [vmem:[%s681_s1] sm:$0x1f]  ;;  %vm558_vm14 = vcmask 1045508  }
   0x4   :  { %592 = vset.pattern.permute.xlu0 %v236_v23  ;;  %593 = vset.pattern.permute.xlu1 %v236_v23  ;;  %v265_v55 = vperm.slane %v232_v42, 4 }
   0x9   :  { %v30_v4 = vld.sshfl [vmem:[#allocation1 + $0x10] sm:$0xff pattern:$0x73625140]  ;;  %v31_v5 = vld.sshfl [vmem:[#allocation1 + $0x18] sm:$0xff pattern:$0x73625140] }
   0xa   :  { %50 = vst [vmem:[#allocation1 + $0x10] ss:$2 sm:$0xff] %v20_v2  ;;  %v28_v6 = vld.sshfl [vmem:[#allocation1] sm:$0xff pattern:$0x73625140] }
   0xb   :  { %v29_v8 = vld.sshfl [vmem:[#allocation1 + $0x8] sm:$0xff pattern:$0x73625140]  ;;  %v34_v9 = vld.sshfl [vmem:[#allocation1 + $0x30] sm:$0xff pattern:$0x73625140] }
   0xc   :  { %48 = vst [vmem:[#allocation1] ss:$2 sm:$0xff] %v19_v3  ;;  %v35_v10 = vld.sshfl [vmem:[#allocation1 + $0x38] sm:$0xff pattern:$0x73625140] }
   0xd   :  { %54 = vst [vmem:[#allocation1 + $0x30] ss:$2 sm:$0xff] %v22_v7  ;;  %v32_v12 = vld.sshfl [vmem:[#allocation1 + $0x20] sm:$0xff pattern:$0x73625140] }
   0xe   :  { %v33_v13 = vld.sshfl [vmem:[#allocation1 + $0x28] sm:$0xff pattern:$0x73625140] }
   0xf   :  { %52 = vst [vmem:[#allocation1 + $0x20] ss:$2 sm:$0xff] %v21_v11 }
  0x11   :  { %v57_v14 = vld.sshfl [vmem:[#allocation1 + $0x10] sm:$0xff pattern:$0x75316420]  ;;  %v58_v15 = vld.sshfl [vmem:[#allocation1 + $0x18] sm:$0xff pattern:$0x75316420] }
  0x12   :  { %126 = vmatpush.xpose.msra.mxu2 %v57_v14  ;;  %146 = vmatpush.xpose.msra.mxu3 %v58_v15  ;;  %349 = vst [vmem:[#allocation1 + $0x10] ss:$2 sm:$0xff] %v20_v2 }
  0x13   :  { %v55_v16 = vld.sshfl [vmem:[#allocation1] sm:$0xff pattern:$0x75316420]  ;;  %v56_v17 = vld.sshfl [vmem:[#allocation1 + $0x8] sm:$0xff pattern:$0x75316420] }
  0x14   :  { %86 = vmatpush.xpose.msra.mxu0 %v55_v16  ;;  %106 = vmatpush.xpose.msra.mxu1 %v56_v17  ;;  %347 = vst [vmem:[#allocation1] ss:$2 sm:$0xff] %v19_v3  ;;  %v61_v18 = vld.sshfl [vmem:[#allocation1 + $0x30] sm:$0xff pattern:$0x75316420] }
  0x15   :  { %127 = vmatmul.f32.vlgmr.msra.gmra.mxu2 %v30_v4  ;;  %147 = vmatmul.f32.vlgmr.msra.gmra.mxu3 %v31_v5  ;;  %v62_v19 = vld.sshfl [vmem:[#allocation1 + $0x38] sm:$0xff pattern:$0x75316420] }
  0x16   :  { %206 = vmatpush.xpose.msrb.mxu2 %v61_v18  ;;  %v59_v20 = vld.sshfl [vmem:[#allocation1 + $0x20] sm:$0xff pattern:$0x75316420]  ;;  %226 = vmatpush.xpose.msrb.mxu3 %v62_v19  ;;  %353 = vst [vmem:[#allocation1 + $0x30] ss:$2 sm:$0xff] %v22_v7 }
  0x17   :  { %87 = vmatmul.f32.vlgmr.msra.gmra.mxu0 %v28_v6  ;;  %107 = vmatmul.f32.vlgmr.msra.gmra.mxu1 %v29_v8  ;;  %v60_v21 = vld.sshfl [vmem:[#allocation1 + $0x28] sm:$0xff pattern:$0x75316420]  ;;  %v233_v6 = vld [vmem:[%s682_s2] sm:$0x7] }
  0x18   :  { %166 = vmatpush.xpose.msrb.mxu0 %v59_v20  ;;  %186 = vmatpush.xpose.msrb.mxu1 %v60_v21  ;;  %351 = vst [vmem:[#allocation1 + $0x20] ss:$2 sm:$0xff] %v21_v11  ;;  %v301_v17 = vperm.slane %v233_v6, 2 }
  0x19   :  { %v356_v22 = vld.sshfl [vmem:[#allocation1 + $0x10] sm:$0xff pattern:$0x75316420]  ;;  %v357_v23 = vld.sshfl [vmem:[#allocation1 + $0x18] sm:$0xff pattern:$0x75316420] }
  0x1a   :  { %580 = vmatpush.msk.msra.mxu2 %vm365_vm2, %v356_v22  ;;  %582 = vmatpush.msk.msra.mxu3 %vm365_vm2, %v357_v23 }
  0x1d   :  { %207 = vmatmul.f32.vlgmr.msrb.gmra.mxu2 %v34_v9  ;;  %227 = vmatmul.f32.vlgmr.msrb.gmra.mxu3 %v35_v10 }
  0x1f   :  { %167 = vmatmul.f32.vlgmr.msrb.gmra.mxu0 %v32_v12  ;;  %187 = vmatmul.f32.vlgmr.msrb.gmra.mxu1 %v33_v13 }
  0x94   :  { %v88_v24 = vpop.f32.mrf.mxu0  ;;  %v108_v25 = vpop.f32.mrf.mxu1 }
  0x95   :  { %v109_v26 = vadd.f32 %v108_v25, %v88_v24  ;;  %v355_v24 = vld.sshfl [vmem:[#allocation1 + $0x8] sm:$0xff pattern:$0x75316420] }
  0x96   :  { %578 = vmatpush.msk.msra.mxu1 %vm365_vm2, %v355_v24 }
  0x98   :  { %v128_v27 = vpop.f32.mrf.mxu2  ;;  %v148_v28 = vpop.f32.mrf.mxu3 }
  0x99   :  { %v129_v29 = vadd.f32 %v128_v27, %v109_v26  ;;  %v354_v27 = vld.sshfl [vmem:[#allocation1] sm:$0xff pattern:$0x75316420] }
  0x9a   :  { %576 = vmatpush.msk.msra.mxu0 %vm365_vm2, %v354_v27 }
  0x9b   :  { %v149_v30 = vadd.f32 %v148_v28, %v129_v29 }
  0x9c   :  { %v168_v31 = vpop.f32.mrf.mxu0  ;;  %v188_v32 = vpop.f32.mrf.mxu1 }
  0x9d   :  { %v169_v33 = vadd.f32 %v168_v31, %v149_v30 }
  0x9f   :  { %v189_v34 = vadd.f32 %v188_v32, %v169_v33  ;;  %v360_v33 = vld.sshfl [vmem:[#allocation1 + $0x30] sm:$0xff pattern:$0x75316420] }
  0xa0   :  { %v208_v35 = vpop.f32.mrf.mxu2  ;;  %v228_v36 = vpop.f32.mrf.mxu3  ;;  %588 = vmatpush.msk.msrb.mxu2 %vm365_vm2, %v360_v33 }
  0xa1   :  { %v209_v37 = vadd.f32 %v208_v35, %v189_v34  ;;  %v361_v34 = vld.sshfl [vmem:[#allocation1 + $0x38] sm:$0xff pattern:$0x75316420]  ;;  %v359_v35 = vld.sshfl [vmem:[#allocation1 + $0x28] sm:$0xff pattern:$0x75316420] }
  0xa2   :  { %590 = vmatpush.msk.msrb.mxu3 %vm365_vm2, %v361_v34  ;;  %586 = vmatpush.msk.msrb.mxu1 %vm365_vm2, %v359_v35 }
  0xa3   :  { %v229_v38 = vadd.f32 %v228_v36, %v209_v37  ;;  %v358_v36 = vld.sshfl [vmem:[#allocation1 + $0x20] sm:$0xff pattern:$0x75316420] }
  0xa4   :  { %584 = vmatpush.msk.msrb.mxu0 %vm365_vm2, %v358_v36 }
  0xa5   :  { %v231_v39 = vmul.f32 0.00390625, %v229_v38 }
  0xa7   :  { %v241_v40 = vperm.slane %v231_v39, 1  ;;  %v234_v41 = vperm.slane %v231_v39, 0 }
  0xa9   :  { %246 = vperm.xlu0 %592, %v241_v40  }
  0xb1   :  { %239 = vperm.xlu0 %592, %v234_v41  }
 0x11b   :  { %v247_v43 = vpop.permute.xlu0 %246 }
 0x11c   :  { %v249_v44 = vmul.f32 %v247_v43, %v232_v42 }
 0x11e   :  { %v258_v45 = vsel %vm250_vm0, %v249_v44, 0.0 }
 0x11f   :  { %v259_v46 = vrot.slane %v258_v45, 4 }
 0x121   :  { %v260_v47 = vadd.f32 %v259_v46, %v258_v45 }
 0x123   :  { %v261_v48 = vrot.slane %v260_v47, 2  ;;  %v240_v49 = vpop.permute.xlu0 %239 }
 0x124   :  { %v248_v50 = vmul.f32 %v240_v49, %v232_v42 }
 0x125   :  { %v262_v51 = vadd.f32 %v261_v48, %v260_v47 }
 0x126   :  { %v251_v52 = vsel %vm250_vm0, %v248_v50, 0.0 }
 0x127   :  { %v252_v53 = vrot.slane %v251_v52, 4  ;;  %v263_v54 = vrot.slane %v262_v51, 1 }
 0x129   :  { %v253_v56 = vadd.f32 %v252_v53, %v251_v52  ;;  %v264_v57 = vadd.f32 %v263_v54, %v262_v51 }
 0x12b   :  { %v254_v58 = vrot.slane %v253_v56, 2  ;;  %v267_v59 = vadd.f32 %v265_v55, %v264_v57 }
 0x12d   :  { %v255_v60 = vadd.f32 %v254_v58, %v253_v56  ;;  %v269_v61 = vmax.f32 %v267_v59, 0.0 }
 0x12f   :  { %v256_v62 = vrot.slane %v255_v60, 1  ;;  %v277_v63 = vperm.slane %v269_v61, 0 }
 0x131   :  { %282 = vperm.xlu1 %593, %v277_v63   ;;  %v257_v2 = vadd.f32 %v256_v62, %v255_v60 }
 0x133   :  { %v266_v3 = vadd.f32 %v265_v55, %v257_v2 }
 0x135   :  { %v268_v4 = vmax.f32 %v266_v3, 0.0 }
 0x137   :  { %v270_v5 = vperm.slane %v268_v4, 0 }
 0x139   :  { %275 = vperm.xlu1 %593, %v270_v5  }
 0x1a3   :  { %v283_v7 = vpop.permute.xlu1 %282 }
 0x1a4   :  { %v285_v8 = vmul.f32 %v283_v7, %v233_v6 }
 0x1a6   :  { %v294_v9 = vsel %vm286_vm1, %v285_v8, 0.0 }
 0x1a7   :  { %v295_v10 = vrot.slane %v294_v9, 4 }
 0x1a9   :  { %v296_v11 = vadd.f32 %v295_v10, %v294_v9 }
 0x1ab   :  { %v297_v12 = vrot.slane %v296_v11, 2  ;;  %v276_v13 = vpop.permute.xlu1 %275 }
 0x1ac   :  { %v284_v14 = vmul.f32 %v276_v13, %v233_v6 }
 0x1ad   :  { %v298_v15 = vadd.f32 %v297_v12, %v296_v11 }
 0x1ae   :  { %v287_v16 = vsel %vm286_vm1, %v284_v14, 0.0 }
 0x1af   :  { %v299_v18 = vrot.slane %v298_v15, 1  ;;  %v288_v19 = vrot.slane %v287_v16, 4 }
 0x1b1   :  { %v300_v20 = vadd.f32 %v299_v18, %v298_v15  ;;  %v289_v21 = vadd.f32 %v288_v19, %v287_v16 }
 0x1b3   :  { %v303_v25 = vadd.f32 %v301_v17, %v300_v20  ;;  %v290_v26 = vrot.slane %v289_v21, 2 }
 0x1b5   :  { %v575_v28 = vmul.f32 -1.442695, %v303_v25  ;;  %v291_v29 = vadd.f32 %v290_v26, %v289_v21 }
 0x1b7   :  { %594 = vpow2.f32 %v575_v28  ;;  %v292_v30 = vrot.slane %v291_v29, 1 }
 0x1b9   :  { %v293_v31 = vadd.f32 %v292_v30, %v291_v29 }
 0x1bb   :  { %v302_v32 = vadd.f32 %v301_v17, %v293_v31 }
 0x1bd   :  { %v595_v37 = vpop.eup %594  ;;  %v574_v38 = vmul.f32 -1.442695, %v302_v32 }
 0x1be   :  { %v311_v39 = vadd.f32 1.0, %v595_v37 }
 0x1bf   :  { %596 = vpow2.f32 %v574_v38 }
 0x1c0   :  { %598 = vrcp.f32 %v311_v39  ;;  %v338_v48 = vand.u32 2147483648, %v311_v39  ;;  %vm332_vm4 = vweird.f32 %v311_v39  ;;  %v336_v49 = vand.u32 2147483647, %v311_v39 }
 0x1c2   :  { %v339_v53 = vor.u32 1.1754944e-38, %v338_v48  ;;  %vm337_vm7 = vcmp.eq.f32.partialorder %v336_v49, 8.507059e+37 }
 0x1c5   :  { %v597_v40 = vpop.eup %596 }
 0x1c6   :  { %v599_v41 = vpop.eup %598  ;;  %v310_v42 = vadd.f32 1.0, %v597_v40 }
 0x1c7   :  { %v328_v43 = vmul.f32 %v599_v41, %v311_v39  ;;  %vm333_vm3 = vweird.f32 %v599_v41 }
 0x1c8   :  { %600 = vrcp.f32 %v310_v42  ;;  %vm334_vm5 = vmor %vm332_vm4, %vm333_vm3  ;;  %v323_v54 = vand.u32 2147483648, %v310_v42  ;;  %v321_v56 = vand.u32 2147483647, %v310_v42  ;;  %vm317_vm8 = vweird.f32 %v310_v42 }
 0x1c9   :  { %v329_v44 = vsub.f32 1.0, %v328_v43 }
 0x1ca   :  { %v324_v59 = vor.u32 1.1754944e-38, %v323_v54  ;;  %vm322_vm11 = vcmp.eq.f32.partialorder %v321_v56, 8.507059e+37 }
 0x1cb   :  { %v330_v45 = vmul.f32 %v599_v41, %v329_v44 }
 0x1cd   :  { %v331_v46 = vadd.f32 %v599_v41, %v330_v45 }
 0x1ce   :  { %v601_v47 = vpop.eup %600 }
 0x1cf   :  { %v313_v50 = vmul.f32 %v601_v47, %v310_v42  ;;  %v335_v52 = vsel %vm334_vm5, %v599_v41, %v331_v46  ;;  %vm318_vm6 = vweird.f32 %v601_v47 }
 0x1d0   :  { %v340_v57 = vsel %vm337_vm7, %v339_v53, %v335_v52  ;;  %vm319_vm9 = vmor %vm317_vm8, %vm318_vm6 }
 0x1d1   :  { %v314_v51 = vsub.f32 1.0, %v313_v50  ;;  %v344_v61 = vrot.slane %v340_v57, 7 }
 0x1d3   :  { %v315_v55 = vmul.f32 %v601_v47, %v314_v51 }
 0x1d5   :  { %v316_v58 = vadd.f32 %v601_v47, %v315_v55 }
 0x1d7   :  { %v320_v60 = vsel %vm319_vm9, %v601_v47, %v316_v58 }
 0x1d8   :  { %v325_v62 = vsel %vm322_vm11, %v324_v59, %v320_v60 }
 0x1d9   :  { %v346_v63 = vsel %vm345_vm10, %v344_v61, %v325_v62 }
 0x1da   :  { %577 = vmatmul.msk.f32.vlgmr.msra.gmra.mxu0 %vm362_vm12, %v346_v63  ;;  %579 = vmatmul.msk.f32.vlgmr.msra.gmra.mxu1 %vm362_vm12, %v346_v63 }
 0x1db   :  { %581 = vmatmul.msk.f32.vlgmr.msra.gmra.mxu2 %vm362_vm12, %v346_v63  ;;  %583 = vmatmul.msk.f32.vlgmr.msra.gmra.mxu3 %vm362_vm12, %v346_v63 }
 0x1e2   :  { %585 = vmatmul.msk.f32.vlgmr.msrb.gmra.mxu0 %vm362_vm12, %v346_v63  ;;  %587 = vmatmul.msk.f32.vlgmr.msrb.gmra.mxu1 %vm362_vm12, %v346_v63 }
 0x1e3   :  { %589 = vmatmul.msk.f32.vlgmr.msrb.gmra.mxu2 %vm362_vm12, %v346_v63  ;;  %591 = vmatmul.msk.f32.vlgmr.msrb.gmra.mxu3 %vm362_vm12, %v346_v63 }
 0x257   :  { %v419_v2 = vpop.f32.mrf.mxu1  ;;  %v399_v3 = vpop.f32.mrf.mxu0 }
 0x258   :  { %v550_v4 = vrot.slane %v419_v2, 6 }
 0x25a   :  { %v557_v9 = vsel %vm556_vm13, %v399_v3, %v550_v4 }
 0x25e   :  { %v439_v5 = vpop.f32.mrf.mxu2  ;;  %v459_v6 = vpop.f32.mrf.mxu3 }
 0x25f   :  { %v551_v7 = vrot.slane %v439_v5, 4  ;;  %v552_v8 = vrot.slane %v459_v6, 2  ;;  %v499_v12 = vpop.f32.mrf.mxu1  ;;  %v479_v19 = vpop.f32.mrf.mxu0 }
 0x260   :  { %v553_v14 = vrot.slane %v499_v12, 6 }
 0x261   :  { %v559_v10 = vsel %vm558_vm14, %v551_v7, %v552_v8 }
 0x262   :  { %v560_v11 = vsel %vm365_vm2, %v557_v9, %v559_v10  ;;  %v561_v20 = vsel %vm556_vm13, %v479_v19, %v553_v14 }
 0x263   :  { %v566_v13 = vmul.f32 %v560_v11, %v630_v0 }
 0x265   :  { %568 = vst [vmem:[%s683_s4] sm:$0xff] %v566_v13 }
 0x266   :  { %v519_v15 = vpop.f32.mrf.mxu2  ;;  %v539_v16 = vpop.f32.mrf.mxu3 }
 0x267   :  { %v554_v17 = vrot.slane %v519_v15, 4  ;;  %v555_v18 = vrot.slane %v539_v16, 2 }
 0x269   :  { %v562_v21 = vsel %vm558_vm14, %v554_v17, %v555_v18 }
 0x26a   :  { %v563_v22 = vsel %vm365_vm2, %v561_v20, %v562_v21 }
 0x26b   :  { %v567_v23 = vmul.f32 %v563_v22, %v636_v1 }
 0x26d   :  { %569 = vst [vmem:[%s683_s4 + $0x8] sm:$0xff] %v567_v23 }

</bundles_post_ra>
